<compile_context>
chip_gen: v6e
topology: v6e:2x2x1
jax: 0.10.0
libtpu: 0.0.40
codegen_flags: <defaults>
</compile_context>

<pallas_src>
import functools

import jax
import jax.numpy as jnp
from jax.experimental import pallas as pl
from jax.experimental.pallas import tpu as pltpu


def _round_up(n, m):
    return ((n + m - 1) // m) * m


def make_stacked_classifier_kernel(n_layers, out_dim, negative_slope=0.01):
    """Builds a kernel taking (x_ref, w0, b0, w1, b1, ..., out_ref)."""

    def kernel(*refs):
        x_ref = refs[0]
        o_ref = refs[-1]
        wb_refs = refs[1:-1]                 # alternating (in,out) weight / (1,out) bias

        x = x_ref[...].astype(jnp.float32)

        # ---- softmax over dim=1 (features) ----
        m = jnp.max(x, axis=1, keepdims=True)
        e = jnp.exp(x - m)
        denom = jnp.sum(e, axis=1, keepdims=True)
        x = e * pl.reciprocal(denom, approx=True)        # EUP reciprocal, off the VALU

        # ---- stacked Linear + LeakyReLU (activation after EVERY layer, incl. last) ----
        for i in range(n_layers):
            w = wb_refs[2 * i][...]                       # (in, out[_lane_padded])
            b = wb_refs[2 * i + 1][...].astype(jnp.float32)
            x = jnp.dot(x.astype(w.dtype), w,
                        preferred_element_type=jnp.float32) + b
            x = jnp.where(x >= 0.0, x, negative_slope * x)     # LeakyReLU

        # ---- log_softmax over dim=1, excluding zero-padded output columns ----
        tile_b, out_pad = x.shape
        lane = jax.lax.broadcasted_iota(jnp.int32, (tile_b, out_pad), 1)
        valid = lane < out_dim
        z = jnp.where(valid, x, jnp.float32(-1e30))       # mask pad lanes out of max/lse
        m2 = jnp.max(z, axis=1, keepdims=True)
        s = z - m2
        lse = jnp.log(jnp.sum(jnp.where(valid, jnp.exp(s), 0.0),
                              axis=1, keepdims=True))
        o_ref[...] = jnp.where(valid, s - lse, 0.0).astype(o_ref.dtype)

    return kernel


def prepare_params(weights, biases, *, lane_pad=128, param_dtype=jnp.float32):
    """One-time parameter prep (NOT in the per-call path):
    transpose PyTorch (out,in) weights to (in,out), reshape biases to (1,out),
    and zero-pad the final layer's output columns up to a lane-dense multiple
    of `lane_pad` so the last matmul/store is full width."""
    n = len(weights)
    ws, bs = [], []
    for i, (w, b) in enumerate(zip(weights, biases)):
        wt = jnp.asarray(w).T.astype(param_dtype)              # (in, out)
        bt = jnp.asarray(b).reshape(1, -1).astype(jnp.float32)  # (1, out)
        if i == n - 1:
            out_dim = wt.shape[1]
            out_pad = _round_up(out_dim, lane_pad)
            if out_pad != out_dim:
                wt = jnp.pad(wt, ((0, 0), (0, out_pad - out_dim)))
                bt = jnp.pad(bt, ((0, 0), (0, out_pad - out_dim)))
        ws.append(wt)
        bs.append(bt)
    return ws, bs


def stacked_classifier_forward(x, prepared_weights, prepared_biases, *,
                               out_dim, tile_b=512, negative_slope=0.01):
    """x: (B, n_classes*ensemble_size); prepared_* from prepare_params()."""
    B, in_dim = x.shape
    n_layers = len(prepared_weights)
    out_pad = prepared_weights[-1].shape[1]

    # Large batch tiles amortize the ~0.35 us per-grid-step overhead; clamp to the
    # batch and keep a multiple of 8 (sublane constraint).
    tile_b = _round_up(min(tile_b, B), 8)
    grid = (pl.cdiv(B, tile_b),)

    in_specs = [pl.BlockSpec((tile_b, in_dim), lambda i: (i, 0))]
    args = [x]
    for w, b in zip(prepared_weights, prepared_biases):
        # Constant index_map -> weights/biases DMA'd once, VMEM-resident across grid.
        in_specs.append(pl.BlockSpec(w.shape, lambda i: (0, 0)))
        in_specs.append(pl.BlockSpec(b.shape, lambda i: (0, 0)))
        args += [w, b]

    out_specs = pl.BlockSpec((tile_b, out_pad), lambda i: (i, 0))

    padded_out = pl.pallas_call(
        make_stacked_classifier_kernel(n_layers, out_dim, negative_slope),
        out_shape=jax.ShapeDtypeStruct((B, out_pad), x.dtype),
        grid=grid,
        in_specs=in_specs,
        out_specs=out_specs,
        compiler_params=pltpu.CompilerParams(
            dimension_semantics=("parallel",),   # megacore-shard the batch on v7x
        ),
    )(*args)

    # TODO(synk): for tiny batches (B << tile_b) the fixed pallas_call launch/DMA
    # overhead dominates; a plain-XLA fallback would win there. Kernel path kept
    # unconditional here for demonstration.
    return padded_out[:, :out_dim]


def init_params(key, ensemble_size, n_classes, n_layers):
    """Deterministic synthetic init matching the module's layer shapes."""
    in_dim = n_classes * ensemble_size
    weights, biases = [], []
    for i in range(n_layers):
        out_dim = 4 if i == n_layers - 1 else in_dim
        key, kw, kb = jax.random.split(key, 3)
        bound = 1.0 / jnp.sqrt(in_dim)
        weights.append(jax.random.uniform(kw, (out_dim, in_dim), jnp.float32,
                                          minval=-bound, maxval=bound))
        biases.append(jax.random.uniform(kb, (out_dim,), jnp.float32,
                                         minval=-bound, maxval=bound))
    return weights, biases


def reference_forward(x, weights, biases, negative_slope=0.01):
    """Pure-JAX reference for validation (original PyTorch-layout params)."""
    h = jax.nn.softmax(x, axis=1)
    for w, b in zip(weights, biases):
        h = h @ w.T + b
        h = jnp.where(h >= 0.0, h, negative_slope * h)
    return jax.nn.log_softmax(h, axis=1)


if __name__ == "__main__":
    ensemble_size = 4
    n_classes = 8
    n_layers = 2           # one hidden (32 -> 32) layer + final (32 -> 4) layer
    batch = 24             # small demo; 3 grid steps of 8 rows exercise the pipeline
    tile_b = 8             # demo tile; use 512-1024 at production batch sizes

    key = jax.random.PRNGKey(0)
    key, kx = jax.random.split(key)
    x = jax.random.normal(kx, (batch, n_classes * ensemble_size), jnp.float32)

    weights, biases = init_params(key, ensemble_size, n_layers=n_layers,
                                  n_classes=n_classes)

    # One-time prep: transpose to (in,out), lane-pad the 4-wide head to 128 cols.
    # On v6e/v7x pass param_dtype=jnp.bfloat16 to halve weight/activation bytes.
    pw, pb = prepare_params(weights, biases, param_dtype=jnp.float32)

    fwd = jax.jit(functools.partial(stacked_classifier_forward,
                                    out_dim=4, tile_b=tile_b))
    out = jax.block_until_ready(fwd(x, pw, pb))

    ref = reference_forward(x, weights, biases)
    assert out.shape == (batch, 4)
    # Tolerance covers the hardware approximate reciprocal in the softmax
    # (pl.reciprocal(approx=True)); with approx=False the kernel matches the
    # reference to ~1e-5.  Any structural/semantic bug would be orders larger.
    assert jnp.allclose(out, ref, atol=5e-3, rtol=0.0), "mismatch vs reference"

    print("KERNEL_OK")
</pallas_src>

<mosaic_0001>
module attributes {stable_mosaic.version = 11 : i64} {
  func.func @kernel(%arg0: i32, %arg1: memref<8x32xf32, #tpu.memory_space<vmem>>, %arg2: memref<32x32xf32, #tpu.memory_space<vmem>>, %arg3: memref<1x32xf32, #tpu.memory_space<vmem>>, %arg4: memref<32x128xf32, #tpu.memory_space<vmem>>, %arg5: memref<1x128xf32, #tpu.memory_space<vmem>>, %arg6: memref<8x128xf32, #tpu.memory_space<vmem>>) attributes {dimension_semantics = [#tpu.dimension_semantics<parallel>], iteration_bounds = array<i64: 3>, scalar_prefetch = 0 : i64, scratch_operands = 0 : i64, tpu.core_type = #tpu.core_type<tc>, window_params = [{transform_indices = @transform_0, window_bounds = array<i64: 8, 32>}, {pipeline_mode = #tpu.pipeline_mode<synchronous>, transform_indices = @transform_1, window_bounds = array<i64: 32, 32>}, {pipeline_mode = #tpu.pipeline_mode<synchronous>, transform_indices = @transform_2, window_bounds = array<i64: 1, 32>}, {pipeline_mode = #tpu.pipeline_mode<synchronous>, transform_indices = @transform_3, window_bounds = array<i64: 32, 128>}, {pipeline_mode = #tpu.pipeline_mode<synchronous>, transform_indices = @transform_4, window_bounds = array<i64: 1, 128>}, {transform_indices = @transform_5, window_bounds = array<i64: 8, 128>}]} {
    %c0 = arith.constant 0 : index
    %c0_0 = arith.constant 0 : index
    %0 = vector.load %arg1[%c0, %c0_0] : memref<8x32xf32, #tpu.memory_space<vmem>>, vector<8x32xf32>
    %cst = arith.constant dense<0xFF800000> : vector<8xf32>
    %1 = vector.multi_reduction <maximumf>, %0, %cst [1] : vector<8x32xf32> to vector<8xf32>
    %2 = vector.shape_cast %1 : vector<8xf32> to vector<8x1xf32>
    %3 = vector.broadcast %2 : vector<8x1xf32> to vector<8x32xf32>
    %4 = arith.subf %0, %3 : vector<8x32xf32>
    %5 = math.exp %4 : vector<8x32xf32>
    %cst_1 = arith.constant dense<0.000000e+00> : vector<8xf32>
    %6 = vector.multi_reduction <add>, %5, %cst_1 [1] : vector<8x32xf32> to vector<8xf32>
    %7 = vector.shape_cast %6 : vector<8xf32> to vector<8x1xf32>
    %8 = tpu.reciprocal %7 {approx = true} : vector<8x1xf32> -> vector<8x1xf32>
    %9 = vector.broadcast %8 : vector<8x1xf32> to vector<8x32xf32>
    %10 = arith.mulf %5, %9 : vector<8x32xf32>
    %c0_2 = arith.constant 0 : index
    %c0_3 = arith.constant 0 : index
    %11 = vector.load %arg2[%c0_2, %c0_3] : memref<32x32xf32, #tpu.memory_space<vmem>>, vector<32x32xf32>
    %c0_4 = arith.constant 0 : index
    %c0_5 = arith.constant 0 : index
    %12 = vector.load %arg3[%c0_4, %c0_5] : memref<1x32xf32, #tpu.memory_space<vmem>>, vector<1x32xf32>
    %cst_6 = arith.constant dense<0.000000e+00> : vector<8x32xf32>
    %13 = tpu.matmul %10, %11, %cst_6 {dimension_numbers = #tpu.dot_dimension_numbers<[1], [0], [0], [1], [0, 0, 1, 1], [], []>} : vector<8x32xf32>, vector<32x32xf32>, vector<8x32xf32> -> vector<8x32xf32>
    %14 = vector.broadcast %12 : vector<1x32xf32> to vector<8x32xf32>
    %15 = arith.addf %13, %14 : vector<8x32xf32>
    %cst_7 = arith.constant 0.000000e+00 : f32
    %16 = vector.broadcast %cst_7 : f32 to vector<8x32xf32>
    %17 = arith.cmpf oge, %15, %16 : vector<8x32xf32>
    %cst_8 = arith.constant 0.00999999977 : f32
    %18 = vector.broadcast %cst_8 : f32 to vector<8x32xf32>
    %19 = arith.mulf %18, %15 : vector<8x32xf32>
    %20 = arith.select %17, %15, %19 : vector<8x32xi1>, vector<8x32xf32>
    %c0_9 = arith.constant 0 : index
    %c0_10 = arith.constant 0 : index
    %21 = vector.load %arg4[%c0_9, %c0_10] : memref<32x128xf32, #tpu.memory_space<vmem>>, vector<32x128xf32>
    %c0_11 = arith.constant 0 : index
    %c0_12 = arith.constant 0 : index
    %22 = vector.load %arg5[%c0_11, %c0_12] : memref<1x128xf32, #tpu.memory_space<vmem>>, vector<1x128xf32>
    %cst_13 = arith.constant dense<0.000000e+00> : vector<8x128xf32>
    %23 = tpu.matmul %20, %21, %cst_13 {dimension_numbers = #tpu.dot_dimension_numbers<[1], [0], [0], [1], [0, 0, 1, 1], [], []>} : vector<8x32xf32>, vector<32x128xf32>, vector<8x128xf32> -> vector<8x128xf32>
    %24 = vector.broadcast %22 : vector<1x128xf32> to vector<8x128xf32>
    %25 = arith.addf %23, %24 : vector<8x128xf32>
    %cst_14 = arith.constant 0.000000e+00 : f32
    %26 = vector.broadcast %cst_14 : f32 to vector<8x128xf32>
    %27 = arith.cmpf oge, %25, %26 : vector<8x128xf32>
    %cst_15 = arith.constant 0.00999999977 : f32
    %28 = vector.broadcast %cst_15 : f32 to vector<8x128xf32>
    %29 = arith.mulf %28, %25 : vector<8x128xf32>
    %30 = arith.select %27, %25, %29 : vector<8x128xi1>, vector<8x128xf32>
    %31 = tpu.iota {dimensions = array<i32: 1>} : vector<8x128xi32>
    %c4_i32 = arith.constant 4 : i32
    %32 = vector.broadcast %c4_i32 : i32 to vector<8x128xi32>
    %33 = arith.cmpi slt, %31, %32 : vector<8x128xi32>
    %cst_16 = arith.constant -1.000000e+30 : f32
    %34 = vector.broadcast %cst_16 : f32 to vector<8x128xf32>
    %35 = arith.select %33, %30, %34 : vector<8x128xi1>, vector<8x128xf32>
    %cst_17 = arith.constant dense<0xFF800000> : vector<8xf32>
    %36 = vector.multi_reduction <maximumf>, %35, %cst_17 [1] : vector<8x128xf32> to vector<8xf32>
    %37 = vector.shape_cast %36 : vector<8xf32> to vector<8x1xf32>
    %38 = vector.broadcast %37 : vector<8x1xf32> to vector<8x128xf32>
    %39 = arith.subf %35, %38 : vector<8x128xf32>
    %40 = math.exp %39 : vector<8x128xf32>
    %cst_18 = arith.constant 0.000000e+00 : f32
    %41 = vector.broadcast %cst_18 : f32 to vector<8x128xf32>
    %42 = arith.select %33, %40, %41 : vector<8x128xi1>, vector<8x128xf32>
    %cst_19 = arith.constant dense<0.000000e+00> : vector<8xf32>
    %43 = vector.multi_reduction <add>, %42, %cst_19 [1] : vector<8x128xf32> to vector<8xf32>
    %44 = vector.shape_cast %43 : vector<8xf32> to vector<8x1xf32>
    %45 = math.log %44 : vector<8x1xf32>
    %46 = vector.broadcast %45 : vector<8x1xf32> to vector<8x128xf32>
    %47 = arith.subf %39, %46 : vector<8x128xf32>
    %cst_20 = arith.constant 0.000000e+00 : f32
    %48 = vector.broadcast %cst_20 : f32 to vector<8x128xf32>
    %49 = arith.select %33, %47, %48 : vector<8x128xi1>, vector<8x128xf32>
    %c0_21 = arith.constant 0 : index
    %c0_22 = arith.constant 0 : index
    %50 = vector.load %arg6[%c0_21, %c0_22] : memref<8x128xf32, #tpu.memory_space<vmem>>, vector<8x128xf32>
    tpu.vector_store %arg6[%c0_21, %c0_22], %49 {strides = array<i32>} : memref<8x128xf32, #tpu.memory_space<vmem>>, vector<8x128xf32>,
    return
  }
  func.func @transform_0(%arg0: i32) -> (i32, i32) {
    %c0_i32 = arith.constant 0 : i32
    %c0_i32_0 = arith.constant 0 : i32
    return %arg0, %c0_i32 : i32, i32
  }
  func.func @transform_1(%arg0: i32) -> (i32, i32) {
    %c0_i32 = arith.constant 0 : i32
    %c0_i32_0 = arith.constant 0 : i32
    %c0_i32_1 = arith.constant 0 : i32
    return %c0_i32, %c0_i32_0 : i32, i32
  }
  func.func @transform_2(%arg0: i32) -> (i32, i32) {
    %c0_i32 = arith.constant 0 : i32
    %c0_i32_0 = arith.constant 0 : i32
    %c0_i32_1 = arith.constant 0 : i32
    return %c0_i32, %c0_i32_0 : i32, i32
  }
  func.func @transform_3(%arg0: i32) -> (i32, i32) {
    %c0_i32 = arith.constant 0 : i32
    %c0_i32_0 = arith.constant 0 : i32
    %c0_i32_1 = arith.constant 0 : i32
    return %c0_i32, %c0_i32_0 : i32, i32
  }
  func.func @transform_4(%arg0: i32) -> (i32, i32) {
    %c0_i32 = arith.constant 0 : i32
    %c0_i32_0 = arith.constant 0 : i32
    %c0_i32_1 = arith.constant 0 : i32
    return %c0_i32, %c0_i32_0 : i32, i32
  }
  func.func @transform_5(%arg0: i32) -> (i32, i32) {
    %c0_i32 = arith.constant 0 : i32
    %c0_i32_0 = arith.constant 0 : i32
    return %arg0, %c0_i32 : i32, i32
  }
}

</mosaic_0001>

<bundles_post_ra>
// kernel: stacked_classifier_forward.1
= control target key start
LH: loop header
LB: loop body
LE: loop exit
PB: predicated region body
PF: predicated region fallthrough
CT: control target
= control target key end

     0   :  { %10 = vsyncpa [#allocation3], 0  ;;  %s977_s0 = inlined_call_operand.hbm [shape: f32[24,32], index: 0, kind: input, shape index: {}]   ;;  %s978_s1 = inlined_call_operand.hbm [shape: f32[32,32], index: 1, kind: input, shape index: {}]   ;;  %s979_s2 = inlined_call_operand.vmem [shape: f32[1,32], index: 2, kind: input, shape index: {}]   ;;  %s980_s3 = inlined_call_operand.hbm [shape: f32[32,128], index: 3, kind: input, shape index: {}]   ;;  %s981_s4 = inlined_call_operand.vmem [shape: f32[1,128], index: 4, kind: input, shape index: {}]   ;;  %s982_s5 = inlined_call_operand.vmem [shape: f32[24,128], index: 5, kind: output, shape index: {}]  }
   0x1   :  { %12 = vsyncpa [#allocation3 + $0x1], 0 }
   0x2   :  { %13 = vsyncpa [#allocation5], 0  ;;  %s836_s18 = smov 0   ;;  %s838_s19 = smov 0  }
   0x3   :  { %s840_s20 = smov 0   ;;  %s842_s21 = smov 0  }
   0x4 LB: > { %s855_s22 = sadd.s32 4294967295, %s797_s21   ;;  %p39_p0 = scmp.ne.s32.totalorder %s789_s19, %s785_s18  ;;  %s797_s21 = sphi %s842_s21, %s997_s21   ;;  %s793_s20 = sphi %s840_s20, %s996_s20   ;;  %s789_s19 = sphi %s838_s19, %s995_s19   ;;  %s785_s18 = sphi %s836_s18, %s994_s18  }
   0x5   : > { %p983_p1 = scmp.eq.s32.totalorder %s855_s22, 0  ;;  %p558_p2 = scmp.ge.s32.totalorder %s797_s21, 1 }
   0x6   : > { %p160_p3 = scmp.lt.s32.totalorder %s797_s21, 4  ;;  %s799_s25 = smov [#allocation4]  }
   0x7   : > { %p863_p4 = por %p983_p1, %p39_p0  ;;  %s172_s26 = sshll.u32 %s799_s25, 4  ;;  %s173_s26 = int_to_ptr.vmem [resolvable:$true] %s172_s26 }
   0x8   : > { %p867_p5 = pnand %p558_p2, %p160_p3  ;;  %s800_s28 = smov [#allocation6]  }
   0x9   : > { %s986_s23 = scalar_select %p863_p4, 1, 0 }
   0xa   : > { %s987_s24 = scalar_select %p867_p5, 1, 0 }
   0xb   : > { %p617_p6 = pneg %p867_p5  ;;  %s188_s29 = sshll.u32 %s800_s28, 4  ;;  %s189_s29 = int_to_ptr.vmem [resolvable:$true] %s188_s29 }
   0xc   : > { %s690_s30 = scalar_lea.vmem %s173_s26, 512  ;;  %p698_p12 = scmp.lt.s32.totalorder %s173_s26, %s173_s26 }
   0xd   : > { %p875_p7 = pnand %p617_p6, %p983_p1  ;;  %p691_p9 = scmp.ne.s32.totalorder %s173_s26, %s690_s30 }
   0xe   : > { %p699_p13 = scmp.lt.s32.totalorder %s690_s30, %s690_s30 }
   0xf   : > { %p681_p8 = pneg %p875_p7 }
  0x10   : > { %p700_p0 = por %p699_p13, %p698_p12 }
  0x11   : > { %p693_p10 = pnand %p691_p9, %p681_p8 }
  0x13   : > { %p694_p11 = pneg %p693_p10 }
  0x15   : > { %p701_p2 = pnand %p700_p0, %p694_p11 }
  0x17   : > { %704 = shalt.err (!%p701_p2)
}
  0x18   : > { %s801_s6 = smov 128   ;;  %s802_s7 = smov 8  }
  0x19   : > { %620 = dma.hbm_to_vmem [thread:$0]  (!%p875_p7), %s978_s1, 512, %s173_s26, [#allocation5], %s801_s6, %s801_s6, %s802_s7  }
  0x1a   : > { %s716_s10 = scalar_lea.vmem %s189_s29, 512  ;;  %p724_p10 = scmp.lt.s32.totalorder %s189_s29, %s189_s29 }
  0x1b   : > { %p717_p3 = scmp.ne.s32.totalorder %s189_s29, %s716_s10  ;;  %p725_p1 = scmp.lt.s32.totalorder %s716_s10, %s716_s10 }
  0x1d   : > { %p719_p6 = pnand %p717_p3, %p681_p8  ;;  %p726_p12 = por %p725_p1, %p724_p10 }
  0x1f   : > { %p720_p9 = pneg %p719_p6 }
  0x21   : > { %p727_p11 = pnand %p726_p12, %p720_p9 }
  0x23   : > { %730 = shalt.err (!%p727_p11)
}
  0x24   : > { %623 = dma.hbm_to_vmem [thread:$0]  (!%p875_p7), %s980_s3, 512, %s189_s29, [#allocation5], %s801_s6, %s801_s6, %s802_s7  }
  0x25   : > { %s898_s13 = sadd.s32 1, %s797_s21   ;;  %s26_s14 = sadd.s32 1, %s793_s20 }
  0x26   : > { %s23_s15 = ssub.s32 %s797_s21, %s898_s13  ;;  %p33_p1 = scmp.ne.s32.totalorder %s793_s20, %s789_s19 }
  0x27   : > { %p24_p8 = scmp.eq.s32.totalorder %s23_s15, 0  ;;  %p34_p13 = scmp.eq.s32.totalorder %s797_s21, 0 }
  0x28   : > { %p630_p0 = scmp.lt.s32.totalorder %s797_s21, 3  ;;  %s205_s16 = sand.u32 1, %s793_s20  }
  0x29   : > { %s909_s17 = scalar_select %p24_p8, %s793_s20, %s26_s14  }
  0x2a   : > { %p35_p2 = por %p34_p13, %p33_p1  ;;  %s562_s18 = sshll.u32 %s205_s16, 3 }
  0x2b   : > { %s563_s25 = sshll.u32 %s797_s21, 7  ;;  %s209_s29 = scalar_lea.vmem [#allocation2], %s562_s18 }
  0x2c   : > { %s915_s28 = scalar_lea.hbm %s977_s0, %s563_s25  ;;  %s216_s30 = sshll.u32 %s209_s29, 4  ;;  %s217_s30 = int_to_ptr.vmem [resolvable:$true] %s216_s30 }
  0x2d   : > { %p917_p7 = pnand %p630_p0, %p35_p2  ;;  %s206_s7 = scalar_lea.sflag [#allocation3], %s205_s16 }
  0x2e   : > { %s731_s8 = scalar_lea.hbm %s915_s28, 128  ;;  %s736_s10 = scalar_lea.hbm %s977_s0, 384 }
  0x2f   : > { %p732_p3 = scmp.ne.s32.totalorder %s915_s28, %s731_s8  ;;  %p733_p6 = pneg %p917_p7 }
  0x30   : > { %p737_p12 = scmp.lt.s32.totalorder %s915_s28, %s977_s0  ;;  %p738_p11 = scmp.lt.s32.totalorder %s736_s10, %s731_s8 }
  0x31   : > { %p734_p9 = pnand %p733_p6, %p732_p3 }
  0x32   : > { %p739_p1 = por %p738_p11, %p737_p12 }
  0x33   : > { %p735_p10 = pneg %p734_p9 }
  0x35   : > { %p740_p8 = pnand %p739_p1, %p735_p10 }
  0x37   : > { %743 = shalt.err (!%p740_p8)
}
  0x38   : > { %s744_s14 = scalar_lea.vmem %s217_s30, 128  ;;  %s803_s15 = smov [#allocation2]  }
  0x39   : > { %p745_p13 = scmp.ne.s32.totalorder %s217_s30, %s744_s14  ;;  %s749_s16 = sshll.u32 %s803_s15, 4  ;;  %s750_s16 = int_to_ptr.vmem [resolvable:$false] %s749_s16 }
  0x3a   : > { %s751_s18 = scalar_lea.vmem %s750_s16, 256  ;;  %p752_p3 = scmp.lt.s32.totalorder %s217_s30, %s750_s16 }
  0x3b   : > { %p747_p0 = pnand %p745_p13, %p733_p6  ;;  %p753_p9 = scmp.lt.s32.totalorder %s751_s18, %s744_s14 }
  0x3d   : > { %p748_p2 = pneg %p747_p0  ;;  %p754_p4 = por %p753_p9, %p752_p3 }
  0x3f   : > { %p755_p5 = pnand %p754_p4, %p748_p2 }
  0x41   : > { %758 = shalt.err (!%p755_p5)
}
  0x42   : > { %627 = dma.hbm_to_vmem [thread:$0]  (!%p917_p7), %s915_s28, 128, %s217_s30, %s206_s7  }
  0x43   : > { %p990_p10 = scmp.ne.s32.totalorder %s987_s24, 0 }
  0x44   : > { %s227_s25 = sand.u32 (!%p990_p10), 1, %s789_s19   ;;  %p991_p6 = scmp.ne.s32.totalorder (!%p990_p10), %s986_s23, 0 }
  0x45   : > { %225 = sbr.rel (%p990_p10) target bundleno = 1103 (0x44f), region = 40  ;;  %s565_s26 = sshll.u32 (!%p990_p10), %s227_s25, 3 }
  0x46   : > { %s228_s27 = scalar_lea.sflag (!%p990_p10), [#allocation3], %s227_s25  ;;  %s231_s29 = scalar_lea.vmem (!%p990_p10), [#allocation2], %s565_s26 }
  0x4a   : > { %776 = dma.done.wait (%p991_p6), %s228_s27, 128  }
  0x4b   : > { %778 = vsyncadd (%p991_p6), %s228_s27, 4294967168  ;;  %p992_p4 = scmp.eq.s32.totalorder %s855_s22, 0 }
  0x4d   : > { %780 = dma.done.wait (%p992_p4), [#allocation5], 1024   ;;  %p993_p5 = pmov %p992_p4 }
  0x4e   : > { %vm270_vm0 = vcmask 261120   ;;  %v269_v0 = vld [vmem:[%s231_s29] sm:$0xff]  ;;  %v804_v8 = vmov 0.0   ;;  %vm805_vm1 = vmmov 0   ;;  %v283_v10 = vld [vmem:[#allocation4 + $0x8] sm:$0xff]  ;;  %v282_v11 = vld [vmem:[#allocation4] sm:$0xff]  ;;  %v456_v25 = vlaneseq }
  0x4f   : > { %782 = vsyncadd (%p993_p5), [#allocation5], 4294966272  ;;  %v271_v1 = vsel %vm270_vm0, %v269_v0, -inf  ;;  %v285_v7 = vld [vmem:[#allocation4 + $0x18] sm:$0xff]  ;;  %585 = vmatprep.subr.mxu0 %v804_v8  ;;  %v284_v9 = vld [vmem:[#allocation4 + $0x10] sm:$0xff]  ;;  %593 = vmatprep.mubr.msk.f32.mxu0 %vm805_vm1, %v804_v8  ;;  %p265_p7 = scmp.lt.s32.totalorder %s855_s22, 2 }
  0x50   : > { %272 = vmax.xlane.f32.xlu0 %v271_v1  ;;  %586 = vmatpush3.msra.mxu0 %v285_v7  ;;  %v372_v12 = vld [vmem:[#allocation6 + $0x18] sm:$0xff]  ;;  %v371_v16 = vld [vmem:[#allocation6 + $0x10] sm:$0xff]  ;;  %v370_v17 = vld [vmem:[#allocation6 + $0x8] sm:$0xff]  ;;  %v457_v27 = vand.u32 127, %v456_v25 }
  0x51   : > { %596 = vmatprep.subr.mxu1 %v804_v8  ;;  %587 = vmatprep.subr.mxu0 %v804_v8  ;;  %v369_v18 = vld [vmem:[#allocation6] sm:$0xff]  ;;  %v569_v19 = vld [vmem:[%s979_s2] ss:$0 sm:$0xff]  ;;  %s999_s22 = smov (!%p265_p7, %s855_s22), 2 }
  0x52   : > { %604 = vmatprep.mubr.msk.f32.mxu1 %vm805_vm1, %v804_v8  ;;  %588 = vmatpush3.msra.mxu0 %v284_v9  ;;  %v571_v26 = vld [vmem:[%s981_s4] ss:$0 sm:$0xff]  ;;  %vm458_vm4 = vcmp.lt.s32.totalorder %v457_v27, 4  ;;  %s568_s6 = sshll.u32 %s999_s22, 3 }
  0x53   : > { %589 = vmatprep.subr.mxu0 %v804_v8  ;;  %597 = vmatpush3.msra.mxu1 %v372_v12  ;;  %s268_s21 = scalar_lea.vmem %s982_s5, %s568_s6 }
  0x54   : > { %590 = vmatpush3.msra.mxu0 %v283_v10  ;;  %598 = vmatprep.subr.mxu1 %v804_v8 }
  0x55   : > { %591 = vmatprep.subr.mxu0 %v804_v8  ;;  %599 = vmatpush3.msra.mxu1 %v371_v16 }
  0x56   : > { %592 = vmatpush3.msra.mxu0 %v282_v11  ;;  %600 = vmatprep.subr.mxu1 %v804_v8 }
  0x57   : > { %601 = vmatpush3.msra.mxu1 %v370_v17 }
  0x58   : > { %602 = vmatprep.subr.mxu1 %v804_v8 }
  0x59   : > { %603 = vmatpush3.msra.mxu1 %v369_v18 }
  0xd9   : > { %v273_v2 = vpop.xlane.xlu0 %272 }
  0xda   : > { %v274_v3 = vsub.f32 %v269_v0, %v273_v2 }
  0xdc   : > { %v275_v4 = vmul.f32 1.442695, %v274_v3 }
  0xde   : > { %671 = vpow2.f32 %v275_v4 }
  0xeb   : > { %v672_v5 = vpop.eup %671 }
  0xec   : > { %v277_v6 = vsel %vm270_vm0, %v672_v5, 0.0 }
  0xed   : > { %278 = vadd.xlane.f32.xlu0 %v277_v6 }
 0x176   : > { %v279_v13 = vpop.xlane.xlu0 %278 }
 0x177   : > { %673 = vrcp.f32 %v279_v13 }
 0x184   : > { %v674_v14 = vpop.eup %673 }
 0x185   : > { %v281_v15 = vmul.f32 %v674_v14, %v672_v5 }
 0x187   : > { %594 = vmatmul.mubr.msk.f32.vlgmr.msra.gmra.mxu0 %vm270_vm0, %v281_v15 }
 0x247   : > { %v362_v20 = vpop.f32.mrf.mxu0 }
 0x248   : > { %v363_v21 = vadd.f32 %v569_v19, %v362_v20 }
 0x249   : > { %v595_v22 = vpop.f32.mrf.mxu0 }
 0x24a   : > { %vm366_vm2 = vcmp.ge.f32.partialorder %v363_v21, 0.0  ;;  %v367_v23 = vmul.f32 0.01, %v363_v21 }
 0x24c   : > { %v368_v24 = vsel %vm366_vm2, %v363_v21, %v367_v23 }
 0x24d   : > { %605 = vmatmul.mubr.msk.f32.vlgmr.msra.gmra.mxu1 %vm270_vm0, %v368_v24 }
 0x30d   : > { %v449_v28 = vpop.f32.mrf.mxu1 }
 0x30e   : > { %v450_v29 = vadd.f32 %v571_v26, %v449_v28 }
 0x30f   : > { %v606_v30 = vpop.f32.mrf.mxu1 }
 0x310   : > { %v454_v31 = vmul.f32 0.01, %v450_v29  ;;  %vm453_vm3 = vcmp.ge.f32.partialorder %v450_v29, 0.0 }
 0x312   : > { %v455_v32 = vsel %vm453_vm3, %v450_v29, %v454_v31 }
 0x313   : > { %v459_v33 = vsel %vm458_vm4, %v455_v32, -1e+30 }
 0x314   : > { %460 = vmax.xlane.f32.xlu1 %v459_v33 }
 0x39d   : > { %v461_v34 = vpop.xlane.xlu1 %460 }
 0x39e   : > { %v462_v35 = vsub.f32 %v459_v33, %v461_v34 }
 0x3a0   : > { %v463_v36 = vmul.f32 1.442695, %v462_v35 }
 0x3a2   : > { %675 = vpow2.f32 %v463_v36 }
 0x3af   : > { %v676_v37 = vpop.eup %675 }
 0x3b0   : > { %v465_v38 = vsel %vm458_vm4, %v676_v37, 0.0 }
 0x3b1   : > { %466 = vadd.xlane.f32.xlu1 %v465_v38 }
 0x43a   : > { %v467_v39 = vpop.xlane.xlu1 %466 }
 0x43b   : > { %677 = vlog2.f32 %v467_v39 }
 0x448   : > { %v678_v40 = vpop.eup %677 }
 0x449   : > { %v469_v41 = vmul.f32 0.6931472, %v678_v40 }
 0x44b   : > { %v470_v42 = vsub.f32 %v462_v35, %v469_v41 }
 0x44d   : > { %v471_v43 = vsel %vm458_vm4, %v470_v42, 0.0 }
 0x44e   : > { %472 = vst [vmem:[%s268_s21] sm:$0xff] %v471_v43 }
 0x44f PF: > { %p16_p12 = scmp.ge.s32.totalorder %s898_s13, 5   ;;  %s994_s18 = smov %s789_s19 }
 0x450   : > { %s995_s19 = smov %s793_s20  ;;  %s996_s20 = smov %s909_s17 }
 0x451   : > { %s997_s21 = smov %s898_s13  ;;  %18 = sbr.rel (!%p16_p12) target bundleno = 4 (0x4), region = 88 }
 0x456   :  { %492 = vsyncpa [#allocation3], 1 }
 0x457   :  { %494 = vsyncpa [#allocation3 + $0x1], 1 }
 0x458   :  { %495 = vsyncpa [#allocation5], 1 }

</bundles_post_ra>
